<compile_context>
chip_gen: v7x
topology: tpu7x:2x2x1
jax: 0.10.0
libtpu: 0.0.40
codegen_flags: <defaults>
</compile_context>

<pallas_src>
import math
import functools

import jax
import jax.numpy as jnp
from jax.experimental import pallas as pl
from jax.experimental.pallas import tpu as pltpu

# ---- true module dimensions (from the PyTorch __init__) --------------------
INPUT_DIM = 784               # mnist_dim
HIDDEN_DIM = INPUT_DIM // 8   # 98
OUTPUT_DIM = 10               # number of MNIST classes


def _pad_to(n, m):
    return ((n + m - 1) // m) * m


H_PAD = _pad_to(HIDDEN_DIM, 128)   # 128
O_PAD = _pad_to(OUTPUT_DIM, 128)   # 128

_NEG_INF = jnp.float32(-1e30)


def classifier_kernel(x_ref, w1_ref, b1_ref, w2_ref, b2_ref, o_ref):
    # hidden = relu(X @ W1 + b1): bf16 MXU inputs, f32 accumulate
    x = x_ref[...].astype(jnp.bfloat16)                              # (TB, 784)
    h = jnp.dot(x, w1_ref[...], preferred_element_type=jnp.float32) + b1_ref[...]
    h = jnp.maximum(h, 0.0)                                          # ReLU (f32 VPU)

    # Dropout(p=0.5) is identity at inference (module.eval()).
    # TODO(synk): add pltpu.prng_random_bits-based Bernoulli mask if train-mode dropout is needed.

    # logits = h @ W2 + b2 ; padded lanes carry -1e30 baked into b2 (W2 pad cols are 0)
    logits = jnp.dot(h.astype(jnp.bfloat16), w2_ref[...],
                     preferred_element_type=jnp.float32) + b2_ref[...]

    # softmax over lanes; padded-lane logits are ~-1e30 so exp underflows to exactly 0
    m = jnp.max(logits, axis=-1, keepdims=True)
    e = jnp.exp(logits - m)
    s = jnp.sum(e, axis=-1, keepdims=True)
    o_ref[...] = e * pl.reciprocal(s, approx=True)


def prepare_params(w1, b1, w2, b2):
    """Pad/cast parameters once (do this outside the hot path and cache the result).

    w1: (784, 98), b1: (98,), w2: (98, 10), b2: (10,)  -- weights pre-transposed
    to (in_features, out_features) so the kernel computes plain X @ W.
    """
    w1_p = jnp.zeros((INPUT_DIM, H_PAD), jnp.bfloat16).at[:, :HIDDEN_DIM].set(
        w1.astype(jnp.bfloat16))
    b1_p = jnp.zeros((1, H_PAD), jnp.float32).at[0, :HIDDEN_DIM].set(b1)
    w2_p = jnp.zeros((H_PAD, O_PAD), jnp.bfloat16).at[:HIDDEN_DIM, :OUTPUT_DIM].set(
        w2.astype(jnp.bfloat16))
    # Bake the class-validity mask into the padded bias lanes: padded W2 columns are
    # zero, so padded logits == b2_pad == -1e30 and softmax ignores them.
    b2_p = jnp.full((1, O_PAD), _NEG_INF, jnp.float32).at[0, :OUTPUT_DIM].set(b2)
    return w1_p, b1_p, w2_p, b2_p


@functools.partial(jax.jit, static_argnames=("block_b",))
def classifier_forward(x, w1_p, b1_p, w2_p, b2_p, *, block_b=1024):
    """x: (B, 784) f32 (unpadded); padded params from prepare_params."""
    B = x.shape[0]
    tb = B if B <= block_b else block_b          # batch tile (full-batch block if small)
    grid = (pl.cdiv(B, tb),)

    out_p = pl.pallas_call(
        classifier_kernel,
        out_shape=jax.ShapeDtypeStruct((B, O_PAD), jnp.float32),
        grid=grid,
        in_specs=[
            pl.BlockSpec((tb, INPUT_DIM), lambda i: (i, 0)),       # batch-tiled X (double-buffered)
            pl.BlockSpec((INPUT_DIM, H_PAD), lambda i: (0, 0)),    # VMEM-resident weights
            pl.BlockSpec((1, H_PAD), lambda i: (0, 0)),
            pl.BlockSpec((H_PAD, O_PAD), lambda i: (0, 0)),
            pl.BlockSpec((1, O_PAD), lambda i: (0, 0)),
        ],
        out_specs=pl.BlockSpec((tb, O_PAD), lambda i: (i, 0)),
        compiler_params=pltpu.CompilerParams(
            dimension_semantics=("parallel",),                     # shard batch over TCs (v7x)
        ),
    )(x, w1_p, b1_p, w2_p, b2_p)

    return out_p[:, :OUTPUT_DIM]


def reference_forward(x, w1, b1, w2, b2):
    h = jnp.maximum(x @ w1 + b1, 0.0)
    logits = h @ w2 + b2
    return jax.nn.softmax(logits, axis=-1)


def _init_linear(key, fan_in, fan_out):
    """Mimic torch.nn.Linear default init: U(-1/sqrt(fan_in), 1/sqrt(fan_in))."""
    kw, kb = jax.random.split(key)
    bound = 1.0 / math.sqrt(fan_in)
    w = jax.random.uniform(kw, (fan_in, fan_out), jnp.float32, -bound, bound)
    b = jax.random.uniform(kb, (fan_out,), jnp.float32, -bound, bound)
    return w, b


if __name__ == "__main__":
    key = jax.random.PRNGKey(0)
    kx, k1, k2 = jax.random.split(key, 3)

    B = 8
    x = jax.random.normal(kx, (B, INPUT_DIM), jnp.float32)
    w1, b1 = _init_linear(k1, INPUT_DIM, HIDDEN_DIM)
    w2, b2 = _init_linear(k2, HIDDEN_DIM, OUTPUT_DIM)

    # pad/cast params once (hoisted out of the per-call path)
    params = prepare_params(w1, b1, w2, b2)

    out = classifier_forward(x, *params)
    out = jax.block_until_ready(out)

    # sanity: shape, finiteness, softmax rows ~1, and close to a pure-JAX f32 reference
    ref = reference_forward(x, w1, b1, w2, b2)
    assert out.shape == (B, OUTPUT_DIM)
    assert bool(jnp.all(jnp.isfinite(out)))
    assert bool(jnp.all(jnp.abs(jnp.sum(out, axis=-1) - 1.0) < 1e-2))
    assert bool(jnp.max(jnp.abs(out - ref)) < 3e-2)

    print("KERNEL_OK")
</pallas_src>

<mosaic_0001>
module attributes {stable_mosaic.version = 11 : i64} {
  func.func @classifier_kernel(%arg0: i32, %arg1: memref<8x784xf32, #tpu.memory_space<vmem>>, %arg2: memref<784x128xbf16, #tpu.memory_space<vmem>>, %arg3: memref<1x128xf32, #tpu.memory_space<vmem>>, %arg4: memref<128x128xbf16, #tpu.memory_space<vmem>>, %arg5: memref<1x128xf32, #tpu.memory_space<vmem>>, %arg6: memref<8x128xf32, #tpu.memory_space<vmem>>) attributes {dimension_semantics = [#tpu.dimension_semantics<parallel>], iteration_bounds = array<i64: 1>, scalar_prefetch = 0 : i64, scratch_operands = 0 : i64, tpu.core_type = #tpu.core_type<tc>, window_params = [{transform_indices = @transform_0, window_bounds = array<i64: 8, 784>}, {pipeline_mode = #tpu.pipeline_mode<synchronous>, transform_indices = @transform_1, window_bounds = array<i64: 784, 128>}, {pipeline_mode = #tpu.pipeline_mode<synchronous>, transform_indices = @transform_2, window_bounds = array<i64: 1, 128>}, {pipeline_mode = #tpu.pipeline_mode<synchronous>, transform_indices = @transform_3, window_bounds = array<i64: 128, 128>}, {pipeline_mode = #tpu.pipeline_mode<synchronous>, transform_indices = @transform_4, window_bounds = array<i64: 1, 128>}, {transform_indices = @transform_5, window_bounds = array<i64: 8, 128>}]} {
    %c0 = arith.constant 0 : index
    %c0_0 = arith.constant 0 : index
    %0 = vector.load %arg1[%c0, %c0_0] : memref<8x784xf32, #tpu.memory_space<vmem>>, vector<8x784xf32>
    %1 = arith.truncf %0 : vector<8x784xf32> to vector<8x784xbf16>
    %c0_1 = arith.constant 0 : index
    %c0_2 = arith.constant 0 : index
    %2 = vector.load %arg2[%c0_1, %c0_2] : memref<784x128xbf16, #tpu.memory_space<vmem>>, vector<784x128xbf16>
    %cst = arith.constant dense<0.000000e+00> : vector<8x128xf32>
    %3 = tpu.matmul %1, %2, %cst {dimension_numbers = #tpu.dot_dimension_numbers<[1], [0], [0], [1], [0, 0, 1, 1], [], []>} : vector<8x784xbf16>, vector<784x128xbf16>, vector<8x128xf32> -> vector<8x128xf32>
    %c0_3 = arith.constant 0 : index
    %c0_4 = arith.constant 0 : index
    %4 = vector.load %arg3[%c0_3, %c0_4] : memref<1x128xf32, #tpu.memory_space<vmem>>, vector<1x128xf32>
    %5 = vector.broadcast %4 : vector<1x128xf32> to vector<8x128xf32>
    %6 = arith.addf %3, %5 : vector<8x128xf32>
    %cst_5 = arith.constant 0.000000e+00 : f32
    %7 = vector.broadcast %cst_5 : f32 to vector<8x128xf32>
    %8 = arith.maximumf %6, %7 : vector<8x128xf32>
    %9 = arith.truncf %8 : vector<8x128xf32> to vector<8x128xbf16>
    %c0_6 = arith.constant 0 : index
    %c0_7 = arith.constant 0 : index
    %10 = vector.load %arg4[%c0_6, %c0_7] : memref<128x128xbf16, #tpu.memory_space<vmem>>, vector<128x128xbf16>
    %cst_8 = arith.constant dense<0.000000e+00> : vector<8x128xf32>
    %11 = tpu.matmul %9, %10, %cst_8 {dimension_numbers = #tpu.dot_dimension_numbers<[1], [0], [0], [1], [0, 0, 1, 1], [], []>} : vector<8x128xbf16>, vector<128x128xbf16>, vector<8x128xf32> -> vector<8x128xf32>
    %c0_9 = arith.constant 0 : index
    %c0_10 = arith.constant 0 : index
    %12 = vector.load %arg5[%c0_9, %c0_10] : memref<1x128xf32, #tpu.memory_space<vmem>>, vector<1x128xf32>
    %13 = vector.broadcast %12 : vector<1x128xf32> to vector<8x128xf32>
    %14 = arith.addf %11, %13 : vector<8x128xf32>
    %cst_11 = arith.constant dense<0xFF800000> : vector<8xf32>
    %15 = vector.multi_reduction <maximumf>, %14, %cst_11 [1] : vector<8x128xf32> to vector<8xf32>
    %16 = vector.shape_cast %15 : vector<8xf32> to vector<8x1xf32>
    %17 = vector.broadcast %16 : vector<8x1xf32> to vector<8x128xf32>
    %18 = arith.subf %14, %17 : vector<8x128xf32>
    %19 = math.exp %18 : vector<8x128xf32>
    %cst_12 = arith.constant dense<0.000000e+00> : vector<8xf32>
    %20 = vector.multi_reduction <add>, %19, %cst_12 [1] : vector<8x128xf32> to vector<8xf32>
    %21 = vector.shape_cast %20 : vector<8xf32> to vector<8x1xf32>
    %22 = tpu.reciprocal %21 {approx = true} : vector<8x1xf32> -> vector<8x1xf32>
    %23 = vector.broadcast %22 : vector<8x1xf32> to vector<8x128xf32>
    %24 = arith.mulf %19, %23 : vector<8x128xf32>
    %c0_13 = arith.constant 0 : index
    %c0_14 = arith.constant 0 : index
    %25 = vector.load %arg6[%c0_13, %c0_14] : memref<8x128xf32, #tpu.memory_space<vmem>>, vector<8x128xf32>
    tpu.vector_store %arg6[%c0_13, %c0_14], %24 {strides = array<i32>} : memref<8x128xf32, #tpu.memory_space<vmem>>, vector<8x128xf32>,
    return
  }
  func.func @transform_0(%arg0: i32) -> (i32, i32) {
    %c0_i32 = arith.constant 0 : i32
    %c0_i32_0 = arith.constant 0 : i32
    return %arg0, %c0_i32 : i32, i32
  }
  func.func @transform_1(%arg0: i32) -> (i32, i32) {
    %c0_i32 = arith.constant 0 : i32
    %c0_i32_0 = arith.constant 0 : i32
    %c0_i32_1 = arith.constant 0 : i32
    return %c0_i32, %c0_i32_0 : i32, i32
  }
  func.func @transform_2(%arg0: i32) -> (i32, i32) {
    %c0_i32 = arith.constant 0 : i32
    %c0_i32_0 = arith.constant 0 : i32
    %c0_i32_1 = arith.constant 0 : i32
    return %c0_i32, %c0_i32_0 : i32, i32
  }
  func.func @transform_3(%arg0: i32) -> (i32, i32) {
    %c0_i32 = arith.constant 0 : i32
    %c0_i32_0 = arith.constant 0 : i32
    %c0_i32_1 = arith.constant 0 : i32
    return %c0_i32, %c0_i32_0 : i32, i32
  }
  func.func @transform_4(%arg0: i32) -> (i32, i32) {
    %c0_i32 = arith.constant 0 : i32
    %c0_i32_0 = arith.constant 0 : i32
    %c0_i32_1 = arith.constant 0 : i32
    return %c0_i32, %c0_i32_0 : i32, i32
  }
  func.func @transform_5(%arg0: i32) -> (i32, i32) {
    %c0_i32 = arith.constant 0 : i32
    %c0_i32_0 = arith.constant 0 : i32
    return %arg0, %c0_i32 : i32, i32
  }
}

</mosaic_0001>

<bundles_post_ra>
// kernel: classifier_forward.1
= control target key start
LH: loop header
LB: loop body
LE: loop exit
PB: predicated region body
PF: predicated region fallthrough
CT: control target
= control target key end

     0   :  { %10 = vsyncpa [#allocation3], 0  ;;  %s1214_s0 = inlined_call_operand.hbm [shape: f32[8,784], index: 0, kind: input, shape index: {}]   ;;  %s1215_s1 = inlined_call_operand.hbm [shape: bf16[784,128], index: 1, kind: input, shape index: {}]   ;;  %s1216_s2 = inlined_call_operand.vmem [shape: f32[1,128], index: 2, kind: input, shape index: {}]   ;;  %s1217_s3 = inlined_call_operand.hbm [shape: bf16[128,128], index: 3, kind: input, shape index: {}]   ;;  %s1218_s4 = inlined_call_operand.vmem [shape: f32[1,128], index: 4, kind: input, shape index: {}]   ;;  %s1219_s5 = inlined_call_operand.hbm [shape: f32[8,128], index: 5, kind: output, shape index: {}]  }
   0x1   :  { %11 = vsyncpa [#allocation6], 0 }
   0x2   :  { %12 = vsyncpa [#allocation4], 0  ;;  %s1103_s18 = smov [#allocation5]   ;;  %s1009_s22 = scalar_lea.hbm %s1215_s1, 6272 }
   0x3   :  { %s28_s19 = sshll.u32 %s1103_s18, 4  ;;  %p1010_p0 = scmp.ne.s32.totalorder %s1215_s1, %s1009_s22  ;;  %s29_s19 = int_to_ptr.vmem [resolvable:$true] %s28_s19 }
   0x4   :  { %p1013_p1 = scmp.lt.u32.totalorder %s1009_s22, %s1215_s1 }
   0x6   :  { %p1015_p2 = pnand %p1013_p1, %p1010_p0 }
   0x8   :  { %1018 = shalt.err (!%p1015_p2)
}
   0x9   :  { %s1019_s27 = scalar_lea.vmem %s29_s19, 6272  ;;  %p1024_p4 = scmp.lt.s32.totalorder %s29_s19, %s29_s19 }
   0xa   :  { %p1020_p3 = scmp.ne.s32.totalorder %s29_s19, %s1019_s27  ;;  %p1025_p5 = scmp.lt.s32.totalorder %s1019_s27, %s1019_s27 }
   0xc   :  { %p1026_p6 = por %p1025_p5, %p1024_p4 }
   0xe   :  { %p1027_p7 = pnand %p1026_p6, %p1020_p3 }
  0x10   :  { %1030 = shalt.err (!%p1027_p7)
}
  0x11   :  { %s1104_s28 = smov 64   ;;  %s1105_s29 = smov 4  }
  0x12   :  { %34 = dma.hbm_to_vmem [thread:$0]  %s1215_s1, 6272, %s29_s19, [#allocation6], %s1104_s28, %s1104_s28, %s1105_s29  }
  0x13   :  { %s1106_s7 = smov [#allocation2]   ;;  %s1107_s9 = smov [#allocation7]  }
  0x14   :  { %s19_s8 = sshll.u32 %s1106_s7, 4  ;;  %s42_s10 = sshll.u32 %s1107_s9, 4  ;;  %s20_s8 = int_to_ptr.vmem [resolvable:$true] %s19_s8  ;;  %s43_s10 = int_to_ptr.vmem [resolvable:$true] %s42_s10 }
  0x15   :  { %s1031_s13 = scalar_lea.hbm %s1214_s0, 896 }
  0x16   :  { %p1032_p8 = scmp.ne.s32.totalorder %s1214_s0, %s1031_s13  ;;  %p1035_p9 = scmp.lt.u32.totalorder %s1031_s13, %s1214_s0 }
  0x18   :  { %p1037_p10 = pnand %p1035_p9, %p1032_p8 }
  0x1a   :  { %1040 = shalt.err (!%p1037_p10)
}
  0x1b   :  { %s1041_s1 = scalar_lea.vmem %s20_s8, 896  ;;  %p1046_p12 = scmp.lt.s32.totalorder %s20_s8, %s20_s8 }
  0x1c   :  { %p1042_p11 = scmp.ne.s32.totalorder %s20_s8, %s1041_s1  ;;  %p1047_p13 = scmp.lt.s32.totalorder %s1041_s1, %s1041_s1 }
  0x1e   :  { %p1048_p0 = por %p1047_p13, %p1046_p12 }
  0x20   :  { %p1049_p1 = pnand %p1048_p0, %p1042_p11 }
  0x22   :  { %1052 = shalt.err (!%p1049_p1)
}
  0x23   :  { %22 = dma.hbm_to_vmem [thread:$0]  %s1214_s0, 896, %s20_s8, [#allocation3]  }
  0x24   :  { %s1053_s22 = scalar_lea.hbm %s1217_s3, 1024 }
  0x25   :  { %p1054_p2 = scmp.ne.s32.totalorder %s1217_s3, %s1053_s22  ;;  %p1057_p3 = scmp.lt.u32.totalorder %s1053_s22, %s1217_s3 }
  0x27   :  { %p1059_p4 = pnand %p1057_p3, %p1054_p2 }
  0x29   :  { %1062 = shalt.err (!%p1059_p4)
}
  0x2a   :  { %s1063_s27 = scalar_lea.vmem %s43_s10, 1024  ;;  %p1068_p6 = scmp.lt.s32.totalorder %s43_s10, %s43_s10 }
  0x2b   :  { %p1064_p5 = scmp.ne.s32.totalorder %s43_s10, %s1063_s27  ;;  %p1069_p7 = scmp.lt.s32.totalorder %s1063_s27, %s1063_s27 }
  0x2d   :  { %p1070_p8 = por %p1069_p7, %p1068_p6 }
  0x2f   :  { %p1071_p9 = pnand %p1070_p8, %p1064_p5 }
  0x31   :  { %1074 = shalt.err (!%p1071_p9)
}
  0x32   :  { %48 = dma.hbm_to_vmem [thread:$0]  %s1217_s3, 1024, %s43_s10, [#allocation6], %s1104_s28, %s1104_s28, %s1105_s29  }
  0x33   :  { %1097 = dma.done.wait [#allocation3], 896  }
  0x34   :  { %1098 = vsyncadd [#allocation3], 4294966400 }
  0x35   :  { %1099 = dma.done.wait [#allocation6], 7296  }
  0x36   :  { %1100 = vsyncadd [#allocation6], 4294960000  ;;  %v948_v0 = vld [vmem:[#allocation5 + $0x40] sm:$0xff]   ;;  %v952_v4 = vld [vmem:[#allocation5 + $0x48] sm:$0xff]   ;;  %v1108_v44 = vmov 0.0   ;;  %vm1109_vm0 = vmmov 0  }
  0x37   :  { %v949_v1 = vld [vmem:[#allocation5] sm:$0xff]   ;;  %837 = vmatprep.subr.bf16.mxu0 %v948_v0  ;;  %v953_v5 = vld [vmem:[#allocation5 + $0x8] sm:$0xff]   ;;  %v956_v8 = vld [vmem:[#allocation5 + $0x50] sm:$0xff]   ;;  %vm474_vm1 = vcmask 130048   ;;  %s1110_s6 = smov [#allocation8]  }
  0x38   :  { %v950_v2 = vld [vmem:[#allocation5 + $0xc0] sm:$0xff]   ;;  %838 = vmatpush3.bf16.msra.mxu0 %v949_v1  ;;  %v954_v6 = vld [vmem:[#allocation5 + $0xc8] sm:$0xff]   ;;  %v957_v9 = vld [vmem:[#allocation5 + $0x10] sm:$0xff]   ;;  %s767_s7 = sshll.u32 %s1110_s6, 4  ;;  %s768_s7 = int_to_ptr.vmem [resolvable:$true] %s767_s7 }
  0x39   :  { %v951_v3 = vld [vmem:[#allocation5 + $0x80] sm:$0xff]   ;;  %859 = vmatprep.subr.bf16.mxu1 %v950_v2  ;;  %839 = vmatprep.subr.bf16.mxu0 %v952_v4  ;;  %v955_v7 = vld [vmem:[#allocation5 + $0x88] sm:$0xff]   ;;  %v958_v10 = vld [vmem:[#allocation5 + $0xd0] sm:$0xff]   ;;  %p1080_p11 = scmp.lt.s32.totalorder %s768_s7, %s768_s7 }
  0x3a   :  { %860 = vmatpush3.bf16.msra.mxu1 %v951_v3  ;;  %v959_v11 = vld [vmem:[#allocation5 + $0x90] sm:$0xff]   ;;  %v960_v12 = vld [vmem:[#allocation5 + $0x58] sm:$0xff]   ;;  %v964_v16 = vld [vmem:[#allocation5 + $0x60] sm:$0xff]  }
  0x3b   :  { %861 = vmatprep.subr.bf16.mxu1 %v954_v6  ;;  %v961_v13 = vld [vmem:[#allocation5 + $0x18] sm:$0xff]   ;;  %v965_v17 = vld [vmem:[#allocation5 + $0x20] sm:$0xff]   ;;  %v968_v20 = vld [vmem:[#allocation5 + $0x68] sm:$0xff]  }
  0x3c   :  { %840 = vmatpush3.bf16.msra.mxu0 %v953_v5  ;;  %v962_v14 = vld [vmem:[#allocation5 + $0xd8] sm:$0xff]   ;;  %v966_v18 = vld [vmem:[#allocation5 + $0xe0] sm:$0xff]   ;;  %v969_v21 = vld [vmem:[#allocation5 + $0x28] sm:$0xff]  }
  0x3d   :  { %841 = vmatprep.subr.bf16.mxu0 %v956_v8  ;;  %v963_v15 = vld [vmem:[#allocation5 + $0x98] sm:$0xff]   ;;  %v967_v19 = vld [vmem:[#allocation5 + $0xa0] sm:$0xff]   ;;  %v970_v22 = vld [vmem:[#allocation5 + $0xe8] sm:$0xff]  }
  0x3e   :  { %862 = vmatpush3.bf16.msra.mxu1 %v955_v7  ;;  %v971_v23 = vld [vmem:[#allocation5 + $0xa8] sm:$0xff]   ;;  %v972_v24 = vld [vmem:[#allocation5 + $0x70] sm:$0xff]   ;;  %v976_v28 = vld [vmem:[#allocation5 + $0x78] sm:$0xff]  }
  0x3f   :  { %863 = vmatprep.subr.bf16.mxu1 %v958_v10  ;;  %v973_v25 = vld [vmem:[#allocation5 + $0x30] sm:$0xff]   ;;  %v977_v29 = vld [vmem:[#allocation5 + $0x38] sm:$0xff]   ;;  %v61_v34 = vld [vmem:[#allocation2] sm:$0xff] }
  0x40   :  { %842 = vmatpush3.bf16.msra.mxu0 %v957_v9  ;;  %v974_v26 = vld [vmem:[#allocation5 + $0xf0] sm:$0xff]   ;;  %v978_v30 = vld [vmem:[#allocation5 + $0xf8] sm:$0xff]   ;;  %v68_v35 = vpack.c.bf16 %v61_v34, %v61_v34  ;;  %v980_v36 = vld [vmem:[#allocation5 + $0x140] sm:$0xff]  }
  0x41   :  { %843 = vmatprep.subr.bf16.mxu0 %v960_v12  ;;  %v975_v27 = vld [vmem:[#allocation5 + $0xb0] sm:$0xff]   ;;  %v979_v33 = vld [vmem:[#allocation5 + $0xb8] sm:$0xff]   ;;  %v64_v37 = vld [vmem:[#allocation2 + $0x18] sm:$0xff] }
  0x42   :  { %864 = vmatpush3.bf16.msra.mxu1 %v959_v11  ;;  %v62_v31 = vld [vmem:[#allocation2 + $0x8] sm:$0xff]  ;;  %v71_v38 = vpack.c.bf16 %v64_v37, %v64_v37  ;;  %v981_v39 = vld [vmem:[#allocation5 + $0x100] sm:$0xff]   ;;  %v63_v40 = vld [vmem:[#allocation2 + $0x10] sm:$0xff] }
  0x43   :  { %865 = vmatprep.subr.bf16.mxu1 %v962_v14  ;;  %v69_v32 = vpack.c.bf16 %v62_v31, %v62_v31  ;;  %v70_v41 = vpack.c.bf16 %v63_v40, %v63_v40  ;;  %v982_v42 = vld [vmem:[#allocation5 + $0x148] sm:$0xff]   ;;  %v984_v45 = vld [vmem:[#allocation5 + $0x150] sm:$0xff]   ;;  %v986_v47 = vld [vmem:[#allocation5 + $0x158] sm:$0xff]  }
  0x44   :  { %844 = vmatpush3.bf16.msra.mxu0 %v961_v13  ;;  %550 = vmatprep.mubr.bf16.mxu1 %v71_v38  ;;  %v983_v43 = vld [vmem:[#allocation5 + $0x108] sm:$0xff]   ;;  %v985_v46 = vld [vmem:[#allocation5 + $0x110] sm:$0xff]   ;;  %v987_v48 = vld [vmem:[#allocation5 + $0x118] sm:$0xff]  }
  0x45   :  { %845 = vmatprep.subr.bf16.mxu0 %v964_v16  ;;  %510 = vmatprep.mubr.bf16.mxu0 %v69_v32  ;;  %v988_v49 = vld [vmem:[#allocation5 + $0x160] sm:$0xff]   ;;  %v990_v51 = vld [vmem:[#allocation5 + $0x168] sm:$0xff]   ;;  %v66_v54 = vld [vmem:[#allocation2 + $0x28] sm:$0xff] }
  0x46   :  { %866 = vmatpush3.bf16.msra.mxu1 %v963_v15  ;;  %v989_v50 = vld [vmem:[#allocation5 + $0x120] sm:$0xff]   ;;  %v991_v52 = vld [vmem:[#allocation5 + $0x128] sm:$0xff]   ;;  %v992_v55 = vld [vmem:[#allocation5 + $0x170] sm:$0xff]   ;;  %v73_v56 = vpack.c.bf16 %v66_v54, %v66_v54 }
  0x47   :  { %867 = vmatprep.subr.bf16.mxu1 %v966_v18  ;;  %v996_v53 = vld [vmem:[#allocation5 + $0x180] sm:$0xff]   ;;  %v67_v57 = vld [vmem:[#allocation2 + $0x30] sm:$0xff]  ;;  %v993_v59 = vld [vmem:[#allocation5 + $0x130] sm:$0xff]  }
  0x48   :  { %846 = vmatpush3.bf16.msra.mxu0 %v965_v17  ;;  %v74_v58 = vpack.c.bf16 %v67_v57, %v67_v57  ;;  %v994_v60 = vld [vmem:[#allocation5 + $0x178] sm:$0xff]   ;;  %v65_v62 = vld [vmem:[#allocation2 + $0x20] sm:$0xff]  ;;  %v998_v1 = vld [vmem:[#allocation7 + $0x8] sm:$0xff]  }
  0x49   :  { %847 = vmatprep.subr.bf16.mxu0 %v968_v20  ;;  %v995_v61 = vld [vmem:[#allocation5 + $0x138] sm:$0xff]   ;;  %v72_v63 = vpack.c.bf16 %v65_v62, %v65_v62  ;;  %v997_v0 = vld [vmem:[#allocation7] sm:$0xff]   ;;  %v1000_v3 = vld [vmem:[#allocation7 + $0x18] sm:$0xff]  }
  0x4a   :  { %868 = vmatpush3.bf16.msra.mxu1 %v967_v19  ;;  %v999_v2 = vld [vmem:[#allocation7 + $0x10] sm:$0xff]   ;;  %v1001_v4 = vld [vmem:[#allocation7 + $0x20] sm:$0xff]   ;;  %v1002_v5 = vld [vmem:[#allocation7 + $0x28] sm:$0xff]  }
  0x4b   :  { %869 = vmatprep.subr.bf16.mxu1 %v970_v22  ;;  %v1003_v6 = vld [vmem:[#allocation7 + $0x30] sm:$0xff]   ;;  %v1004_v7 = vld [vmem:[#allocation7 + $0x38] sm:$0xff]   ;;  %v777_v9 = vld [vmem:[%s1216_s2] ss:$0 sm:$0xff] }
  0x4c   :  { %848 = vmatpush3.bf16.msra.mxu0 %v969_v21  ;;  %v828_v34 = vld [vmem:[%s1218_s4] ss:$0 sm:$0xff]  ;;  %s1075_s4 = scalar_lea.vmem %s768_s7, 128 }
  0x4d   :  { %849 = vmatprep.subr.bf16.mxu0 %v972_v24  ;;  %p1076_p10 = scmp.ne.s32.totalorder %s768_s7, %s1075_s4  ;;  %p1081_p12 = scmp.lt.s32.totalorder %s1075_s4, %s1075_s4 }
  0x4e   :  { %870 = vmatpush3.bf16.msra.mxu1 %v971_v23 }
  0x4f   :  { %871 = vmatprep.subr.bf16.mxu1 %v974_v26  ;;  %p1082_p13 = por %p1081_p12, %p1080_p11 }
  0x50   :  { %850 = vmatpush3.bf16.msra.mxu0 %v973_v25 }
  0x51   :  { %851 = vmatprep.subr.bf16.mxu0 %v976_v28  ;;  %p1083_p0 = pnand %p1082_p13, %p1076_p10 }
  0x52   :  { %872 = vmatpush3.bf16.msra.mxu1 %v975_v27 }
  0x53   :  { %873 = vmatprep.subr.bf16.mxu1 %v978_v30 }
  0x54   :  { %852 = vmatpush3.bf16.msra.mxu0 %v977_v29 }
  0x55   :  { %881 = vmatprep.subr.bf16.mxu0 %v980_v36 }
  0x56   :  { %874 = vmatpush3.bf16.msra.mxu1 %v979_v33 }
  0x57   :  { %511 = vmatmul.mubr.bf16.vlgmr.msra.gmra.mrb[0].mxu0 %v68_v35  ;;  %914 = vmatprep.subr.bf16.mxu1 %v1108_v44 }
  0x58   :  { %882 = vmatpush3.bf16.msra.mxu0 %v981_v39  ;;  %590 = vmatprep.mubr.bf16.mxu0 %v73_v56 }
  0x59   :  { %551 = vmatmul.mubr.bf16.vlgmr.msra.gmra.mrb[0].mxu1 %v70_v41  ;;  %883 = vmatprep.subr.bf16.mxu0 %v982_v42 }
  0x5a   :  { %916 = vmatprep.mubr.msk.bf16.mxu1 %vm1109_vm0, %v1108_v44  ;;  %915 = vmatpush3.bf16.msra.mxu1 %v996_v53 }
  0x5b   :  { %920 = vmatprep.subr.bf16.mxu1 %v1108_v44 }
  0x5c   :  { %884 = vmatpush3.bf16.msra.mxu0 %v983_v43 }
  0x5d   :  { %885 = vmatprep.subr.bf16.mxu0 %v984_v45 }
  0x60   :  { %886 = vmatpush3.bf16.msra.mxu0 %v985_v46 }
  0x61   :  { %887 = vmatprep.subr.bf16.mxu0 %v986_v47  ;;  %917 = vmatmul.mubr.msk.bf16.vlgmr.msra.gmra.mrb[4].mxu1 %vm474_vm1, %v74_v58 }
  0x62   :  { %936 = vmatprep.mubr.msk.bf16.mxu1 %vm1109_vm0, %v1108_v44  ;;  %921 = vmatpush3.bf16.msra.mxu1 %v997_v0 }
  0x63   :  { %922 = vmatprep.subr.bf16.mxu1 %v1108_v44 }
  0x64   :  { %888 = vmatpush3.bf16.msra.mxu0 %v987_v48 }
  0x65   :  { %889 = vmatprep.subr.bf16.mxu0 %v988_v49 }
  0x66   :  { %923 = vmatpush3.bf16.msra.mxu1 %v998_v1 }
  0x67   :  { %924 = vmatprep.subr.bf16.mxu1 %v1108_v44 }
  0x68   :  { %890 = vmatpush3.bf16.msra.mxu0 %v989_v50 }
  0x69   :  { %891 = vmatprep.subr.bf16.mxu0 %v990_v51 }
  0x6a   :  { %925 = vmatpush3.bf16.msra.mxu1 %v999_v2 }
  0x6b   :  { %926 = vmatprep.subr.bf16.mxu1 %v1108_v44 }
  0x6c   :  { %892 = vmatpush3.bf16.msra.mxu0 %v991_v52 }
  0x6d   :  { %893 = vmatprep.subr.bf16.mxu0 %v992_v55 }
  0x6e   :  { %927 = vmatpush3.bf16.msra.mxu1 %v1000_v3 }
  0x6f   :  { %928 = vmatprep.subr.bf16.mxu1 %v1108_v44 }
  0x70   :  { %894 = vmatpush3.bf16.msra.mxu0 %v993_v59 }
  0x71   :  { %895 = vmatprep.subr.bf16.mxu0 %v994_v60 }
  0x72   :  { %929 = vmatpush3.bf16.msra.mxu1 %v1001_v4 }
  0x73   :  { %930 = vmatprep.subr.bf16.mxu1 %v1108_v44 }
  0x74   :  { %896 = vmatpush3.bf16.msra.mxu0 %v995_v61 }
  0x76   :  { %931 = vmatpush3.bf16.msra.mxu1 %v1002_v5 }
  0x77   :  { %591 = vmatmul.mubr.bf16.vlgmr.msra.gmra.mrb[4].mxu0 %v72_v63  ;;  %932 = vmatprep.subr.bf16.mxu1 %v1108_v44 }
  0x7a   :  { %933 = vmatpush3.bf16.msra.mxu1 %v1003_v6 }
  0x7b   :  { %934 = vmatprep.subr.bf16.mxu1 %v1108_v44 }
  0x7e   :  { %935 = vmatpush3.bf16.msra.mxu1 %v1004_v7 }
 0x12a   :  { %v853_v8 = vpop.f32.mrb[0].mxu0 }
 0x12b   :  { %v854_v10 = vpop.f32.mrb[1].mxu0 }
 0x12c   :  { %v855_v11 = vadd.f32 %v854_v10, %v853_v8  ;;  %v856_v12 = vpop.f32.mrb[2].mxu0  ;;  %v875_v13 = vpop.f32.mrb[0].mxu1 }
 0x12d   :  { %v857_v14 = vpop.f32.mrb[3].mxu0  ;;  %v876_v16 = vpop.f32.mrb[1].mxu1 }
 0x12e   :  { %v513_v15 = vadd.f32 %v855_v11, %v777_v9  ;;  %v877_v17 = vadd.f32 %v876_v16, %v875_v13  ;;  %v878_v18 = vpop.f32.mrb[2].mxu1 }
 0x12f   :  { %v879_v19 = vpop.f32.mrb[3].mxu1 }
 0x130   :  { %v553_v20 = vadd.f32 %v877_v17, %v513_v15 }
 0x134   :  { %v632_v21 = vpop.f32.mrb[4].mxu1 }
 0x135   :  { %v918_v22 = vpop.f32.mrb[5].mxu1 }
 0x136   :  { %v635_v23 = vpop.f32.mrb[6].mxu1 }
 0x137   :  { %v919_v24 = vpop.f32.mrb[7].mxu1 }
 0x14a   :  { %v897_v25 = vpop.f32.mrb[4].mxu0 }
 0x14b   :  { %v898_v26 = vpop.f32.mrb[5].mxu0 }
 0x14c   :  { %v899_v27 = vadd.f32 %v898_v26, %v897_v25  ;;  %v900_v28 = vpop.f32.mrb[6].mxu0 }
 0x14d   :  { %v901_v29 = vpop.f32.mrb[7].mxu0 }
 0x14e   :  { %v593_v30 = vadd.f32 %v899_v27, %v553_v20 }
 0x150   :  { %v633_v31 = vadd.f32 %v632_v21, %v593_v30 }
 0x152   :  { %v638_v32 = vmax.f32 %v633_v31, 0.0 }
 0x154   :  { %v639_v33 = vpack.c.bf16 %v638_v32, %v638_v32 }
 0x156   :  { %937 = vmatmul.mubr.bf16.vlgmr.msra.gmra.mrb[8].mxu1 %v639_v33 }
 0x229   :  { %v745_v35 = vpop.f32.mrb[8].mxu1 }
 0x22a   :  { %v746_v36 = vadd.f32 %v828_v34, %v745_v35  ;;  %v938_v37 = vpop.f32.mrb[9].mxu1 }
 0x22b   :  { %v748_v38 = vpop.f32.mrb[10].mxu1 }
 0x22c   :  { %751 = vmax.xlane.f32.xlu0 %v746_v36  ;;  %v939_v39 = vpop.f32.mrb[11].mxu1 }
 0x2b9   :  { %v752_v40 = vpop.xlane.xlu0 %751 }
 0x2ba   :  { %v753_v41 = vsub.f32 %v746_v36, %v752_v40 }
 0x2bc   :  { %v754_v42 = vmul.f32 1.442695, %v753_v41 }
 0x2be   :  { %1005 = vpow2.f32 %v754_v42 }
 0x2c8   :  { %v1006_v43 = vpop.eup %1005 }
 0x2c9   :  { %756 = vadd.xlane.f32.xlu0 %v1006_v43 }
 0x356   :  { %v757_v44 = vpop.xlane.xlu0 %756 }
 0x357   :  { %1007 = vrcp.f32 %v757_v44 }
 0x361   :  { %v1008_v45 = vpop.eup %1007 }
 0x362   :  { %v759_v46 = vmul.f32 %v1008_v45, %v1006_v43 }
 0x364   :  { %760 = vst [vmem:[#allocation8] sm:$0xff] %v759_v46 }
 0x365   :  { %1086 = shalt.err (!%p1083_p0)
}
 0x366   :  { %s1087_s10 = scalar_lea.hbm %s1219_s5, 128 }
 0x367   :  { %p1088_p1 = scmp.ne.s32.totalorder %s1219_s5, %s1087_s10  ;;  %p1091_p2 = scmp.lt.u32.totalorder %s1087_s10, %s1219_s5 }
 0x369   :  { %p1093_p3 = pnand %p1091_p2, %p1088_p1 }
 0x36b   :  { %1096 = shalt.err (!%p1093_p3)
}
 0x36c   :  { %770 = dma.vmem_to_hbm [thread:$0]  %s768_s7, 128, %s1219_s5, [#allocation4]  }
 0x36d   :  { %1101 = dma.done.wait [#allocation4], 128  }
 0x36e   :  { %1102 = vsyncadd [#allocation4], 4294967168 }
 0x36f   :  { %774 = vsyncpa [#allocation3], 1 }
 0x370   :  { %775 = vsyncpa [#allocation6], 1 }
 0x371   :  { %776 = vsyncpa [#allocation4], 1 }

</bundles_post_ra>
